<compile_context>
chip_gen: v7x
topology: tpu7x:2x2x1
jax: 0.10.0
libtpu: 0.0.40
codegen_flags: <defaults>
</compile_context>

<pallas_src>
import functools

import numpy as np

import jax
import jax.numpy as jnp
from jax.experimental import pallas as pl
from jax.experimental.pallas import tpu as pltpu

KH = KW = 3          # 3x3 conv, stride 1, VALID padding
LANE = 128           # TPU lane width
SUB = 8              # TPU sublane count (f32)


def _placement(rows, width, col_offset, dtype=jnp.float32):
    """Exact 0/1 matrix P with P[r, col_offset + r] = 1.

    A narrow (B, rows) block matmul'd with P lands at lanes
    [col_offset, col_offset + rows) of a `width`-wide slab.  Multiplying by
    exact 1.0 / 0.0 and accumulating in f32 is exact, so this is pure layout
    plumbing done on the (otherwise idle) MXU - no masked partial stores and
    no unaligned lane concatenation.
    """
    r = jax.lax.broadcasted_iota(jnp.int32, (rows, width), 0)
    c = jax.lax.broadcasted_iota(jnp.int32, (rows, width), 1)
    return (c == r + col_offset).astype(dtype)


# --------------------------------------------------------------------------
# Fused kernel: conv (ONE row-strip matmul) -> ReLU -> fc4 -> ReLU -> fc5
#               -> ReLU -> [register MaxPool1d] -> single 128-wide slab store
# --------------------------------------------------------------------------
def fused_augmented_kernel(xs_ref, wmat_ref, bconv_ref, w4t_ref, b4_ref,
                           w5_ref, b5_ref, a_ref, o_ref,
                           *, batch, batch_pad, n_strips, maxpool_size):
    # xs_ref   : (Ho*batch_pad, KH*W*Cin) bf16  row strips, batch padded to 8 sublanes
    # wmat_ref : (KH*W*Cin, PIECE)        bf16  row-strip conv matrix, PIECE = 128
    # bconv_ref: (1, PIECE)               f32   conv bias tiled over (w, c), pad cols = 0
    # w4t_ref  : (hidden, Ho*PIECE)       bf16  fc4 weight, rows pre-permuted to the
    #                                           NCHW flatten order, zero-padded, stored
    #                                           transposed (lane-dense)
    # b4_ref   : (1, hidden) f32          w5_ref: (hidden, hidden) f32 (columns
    #                                           pre-permuted group-major when pooling)
    # b5_ref   : (1, hidden) f32          a_ref: (batch, NA_pad) f32 actions
    # o_ref    : (batch, 128) f32         lane-dense output slab

    # Conv: ONE MXU matmul over all row strips (full 8-sublane LHS pushes,
    # weight pushed once).  bf16 operands, f32 accumulation.
    conv = jax.lax.dot_general(xs_ref[...], wmat_ref[...],
                               (((1,), (0,)), ((), ())),
                               preferred_element_type=jnp.float32)   # (Ho*bp, PIECE)
    conv = jnp.maximum(conv + bconv_ref[...], 0.0)                   # f32 bias + ReLU

    # Strips -> NCHW-flatten order: 8-aligned sublane slices + 128-aligned
    # lane concat (pure relayout, no extra VMEM traffic).
    feat = jnp.concatenate(
        [conv[h * batch_pad:h * batch_pad + batch, :] for h in range(n_strips)],
        axis=1)                                                      # (B, Ho*PIECE)

    # fc4: feat @ w4t.T - bf16 operands on the MXU, f32 accumulation.
    h = jax.lax.dot_general(feat.astype(jnp.bfloat16), w4t_ref[...],
                            (((1,), (1,)), ((), ())),
                            preferred_element_type=jnp.float32)      # (B, hidden)
    h = jnp.maximum(h + b4_ref[...], 0.0)                            # f32 bias + ReLU

    # fc5 (tiny, kept fully f32).
    h = jax.lax.dot_general(h, w5_ref[...], (((1,), (0,)), ((), ())),
                            preferred_element_type=jnp.float32)
    h = jnp.maximum(h + b5_ref[...], 0.0)                            # (B, hidden)

    # MaxPool1d (floor semantics) in registers: w5 columns were pre-permuted
    # offline so group element r of group g sits at lane r*groups + g, making
    # the pool a chain of contiguous lane-slice maxima on the VPU.
    if maxpool_size > 1:
        groups = h.shape[1] // maxpool_size
        pooled = h[:, :groups]
        for r in range(1, maxpool_size):
            pooled = jnp.maximum(pooled, h[:, r * groups:(r + 1) * groups])
        h = pooled                                                   # (B, hidden // mp)
    d_out = h.shape[1]

    # Build the whole 128-wide output slab [fc_out | actions | 0] in registers
    # and write it with ONE full-width lane-dense store.
    out_w = o_ref.shape[1]
    slab = jax.lax.dot_general(h, _placement(d_out, out_w, 0),
                               (((1,), (0,)), ((), ())),
                               preferred_element_type=jnp.float32)
    slab = slab + jax.lax.dot_general(
        a_ref[...], _placement(a_ref.shape[1], out_w, d_out),
        (((1,), (0,)), ((), ())),
        preferred_element_type=jnp.float32)
    o_ref[...] = slab


# --------------------------------------------------------------------------
# One-time parameter prep (all runtime-free):
#   * row-strip conv matrix (lane-padded to 128 output columns), bf16
#   * conv bias tiled into (w, c) order (one row, broadcast over all strips)
#   * fc4 weight: rows permuted NCHW-flatten -> NHWC-flatten, zero-padded to the
#     per-strip padded layout, stored transposed (hidden, feat_dim_padded), bf16
#   * fc5 weight/bias columns permuted group-major if maxpool_size > 1
# --------------------------------------------------------------------------
def prepare_params(params, input_shape_nchw, maxpool_size=1):
    _, c_in, h_in, w_in = input_shape_nchw
    ho, wo = h_in - KH + 1, w_in - KW + 1
    wc = np.asarray(params["w_conv"], np.float32)            # (KH, KW, Cin, Cout)
    bc = np.asarray(params["b_conv"], np.float32).reshape(-1)
    c_out = wc.shape[-1]

    piece_w = wo * c_out                                     # live cols per strip
    piece = -(-piece_w // LANE) * LANE                       # lane-padded (128)

    # W_rowstrip[(kh, iw, cin), (w, c)] = w_conv[kh, iw - w, cin, c] (else 0)
    wmat = np.zeros((KH * w_in * c_in, piece), np.float32)
    for kh in range(KH):
        for kw in range(KW):
            for w in range(wo):
                r0 = (kh * w_in + (w + kw)) * c_in
                wmat[r0:r0 + c_in, w * c_out:(w + 1) * c_out] = wc[kh, kw]

    bconv = np.zeros((1, piece), np.float32)
    bconv[0, :piece_w] = np.tile(bc, wo)                     # same for every strip row

    # permutation: NHWC flatten index (h, w, c) -> PyTorch NCHW flatten index (c, h, w)
    feat_dim = c_out * ho * wo
    perm = np.arange(feat_dim).reshape(c_out, ho, wo).transpose(1, 2, 0).reshape(-1)
    w4n = np.asarray(params["w4"], np.float32)[perm]          # (feat_dim, hidden)
    hidden = w4n.shape[1]
    w4p = np.zeros((ho, piece, hidden), np.float32)
    w4p[:, :piece_w, :] = w4n.reshape(ho, piece_w, hidden)    # zero rows at padded feats
    w4t = w4p.reshape(ho * piece, hidden).T                   # (hidden, Ho*PIECE)

    # fc5: permute output columns group-major so the in-kernel maxpool is a
    # chain of contiguous lane-slice maxima (pure column reorder, exact).
    w5 = np.asarray(params["w5"], np.float32)
    b5 = np.asarray(params["b5"], np.float32).reshape(1, -1)
    n5 = w5.shape[1]
    if maxpool_size > 1:
        groups = n5 // maxpool_size
        used = groups * maxpool_size
        k = np.arange(used)
        colperm = np.concatenate([(k % groups) * maxpool_size + (k // groups),
                                  np.arange(used, n5)])
        w5 = w5[:, colperm]
        b5 = b5[:, colperm]

    return {
        "wmat": jnp.asarray(wmat, jnp.bfloat16),              # MXU operand -> bf16
        "bconv": jnp.asarray(bconv, jnp.float32),
        "w4t": jnp.asarray(np.ascontiguousarray(w4t), jnp.bfloat16),
        "b4": jnp.asarray(np.asarray(params["b4"], np.float32).reshape(1, -1)),
        "w5": jnp.asarray(w5, jnp.float32),
        "b5": jnp.asarray(b5, jnp.float32),
        "maxpool_size": maxpool_size,
    }


# --------------------------------------------------------------------------
# AugmentedModel forward (wrapper glue around one pallas_call)
# --------------------------------------------------------------------------
def augmented_model_forward(x_nchw, prep, actions=None, action_history_size=10):
    b, c_in, h_in, w_in = x_nchw.shape
    ho = h_in - KH + 1
    k_strip = KH * w_in * c_in
    maxpool_size = prep["maxpool_size"]
    hidden = prep["w5"].shape[1]
    d_out = hidden // maxpool_size if maxpool_size > 1 else hidden

    if actions is None:
        actions = jnp.zeros((b, action_history_size), jnp.float32)
    na = actions.shape[1]
    na_pad = -(-na // SUB) * SUB                              # 8-aligned contraction dim
    acts = jnp.pad(actions.astype(jnp.float32), ((0, 0), (0, na_pad - na)))

    out_w = max(LANE, -(-(d_out + na_pad) // LANE) * LANE)    # lane-dense output width
    batch_pad = -(-b // SUB) * SUB                            # sublane-aligned batch

    # Layout plumbing on the tiny input (cheap XLA fusion): NCHW -> NHWC rows,
    # overlapping KH-row strips, batch padded to 8 sublanes, flattened to a 2-D
    # slab so the kernel gets ONE dense DMA and ONE full-sublane conv matmul.
    x_rows = jnp.transpose(x_nchw, (0, 2, 3, 1)).reshape(b, h_in, w_in * c_in)
    strips = jnp.stack([x_rows[:, h:h + KH, :].reshape(b, k_strip)
                        for h in range(ho)], axis=0)          # (Ho, B, K)
    strips = jnp.pad(strips, ((0, 0), (0, batch_pad - b), (0, 0)))
    x_strips = strips.reshape(ho * batch_pad, k_strip).astype(jnp.bfloat16)

    kern = functools.partial(fused_augmented_kernel, batch=b, batch_pad=batch_pad,
                             n_strips=ho, maxpool_size=maxpool_size)

    def _full(a):
        nd = a.ndim
        return pl.BlockSpec(a.shape, lambda i, nd=nd: (0,) * nd)

    args = (x_strips, prep["wmat"], prep["bconv"], prep["w4t"],
            prep["b4"], prep["w5"], prep["b5"], acts)

    piece = prep["wmat"].shape[1]
    flops = 2 * (x_strips.shape[0] * k_strip * piece          # conv
                 + b * prep["w4t"].shape[1] * hidden          # fc4
                 + b * hidden * hidden                        # fc5
                 + b * (d_out + na_pad) * out_w)              # placement matmuls
    bytes_accessed = (sum(int(np.prod(a.shape)) * a.dtype.itemsize for a in args)
                      + b * out_w * 4)

    out = pl.pallas_call(
        kern,
        out_shape=jax.ShapeDtypeStruct((b, out_w), jnp.float32),
        grid=(1,),                               # whole problem in one grid step
        in_specs=[_full(a) for a in args],
        out_specs=pl.BlockSpec((b, out_w), lambda i: (0, 0)),
        compiler_params=pltpu.CompilerParams(
            dimension_semantics=("arbitrary",)),
        cost_estimate=pl.CostEstimate(flops=int(flops), transcendentals=0,
                                      bytes_accessed=int(bytes_accessed)),
    )(*args)
    # TODO(synk): skip_backbone / log_softmax flags of the PyTorch forward are
    # unused in the reference path and therefore not wired up here.
    return out[:, :d_out + na]


# --------------------------------------------------------------------------
if __name__ == "__main__":
    key = jax.random.PRNGKey(0)
    kx, ka, k1, k2, k3, k4, k5, k6 = jax.random.split(key, 8)

    B, Cin, H, W = 2, 4, 16, 16
    Cout = 8
    Ho, Wo = H - KH + 1, W - KW + 1        # 14, 14
    feat_dim = Cout * Ho * Wo              # 1568
    hidden = 32
    action_history_size = 10

    x = jax.random.normal(kx, (B, Cin, H, W), jnp.float32)
    actions = jax.random.normal(ka, (B, action_history_size), jnp.float32)

    # "PyTorch layout" parameters (w4 rows ordered like the NCHW flatten).
    params = {
        "w_conv": 0.1 * jax.random.normal(k1, (KH, KW, Cin, Cout), jnp.float32),
        "b_conv": 0.1 * jax.random.normal(k2, (1, Cout), jnp.float32),
        "w4": 0.05 * jax.random.normal(k3, (feat_dim, hidden), jnp.float32),
        "b4": 0.05 * jax.random.normal(k4, (1, hidden), jnp.float32),
        "w5": 0.05 * jax.random.normal(k5, (hidden, hidden), jnp.float32),
        "b5": 0.05 * jax.random.normal(k6, (1, hidden), jnp.float32),
    }

    # Pure-JAX f32 reference with PyTorch semantics (NCHW flatten, MaxPool1d floor).
    def reference(xr, pr, acts, mp):
        x_nhwc = jnp.transpose(xr, (0, 2, 3, 1))
        c = jax.lax.conv_general_dilated(
            x_nhwc, pr["w_conv"], (1, 1), "VALID",
            dimension_numbers=("NHWC", "HWIO", "NHWC"))
        c = jnp.maximum(c + pr["b_conv"][0], 0.0)
        feat = jnp.transpose(c, (0, 3, 1, 2)).reshape(xr.shape[0], -1)
        h = jnp.maximum(feat @ pr["w4"] + pr["b4"], 0.0)
        h = jnp.maximum(h @ pr["w5"] + pr["b5"], 0.0)
        if mp > 1:
            bh, dh = h.shape
            h = h[:, :(dh // mp) * mp].reshape(bh, dh // mp, mp).max(-1)
        return jnp.concatenate([h, acts], axis=1)

    # bf16 weights on the MXU -> tolerance loosened vs. the f32 reference.
    ATOL = RTOL = 3e-2

    for mp in (1, 2):                      # default path + maxpool path
        prep = prepare_params(params, (B, Cin, H, W), maxpool_size=mp)
        out = augmented_model_forward(
            x, prep, actions=actions, action_history_size=action_history_size)
        out = jax.block_until_ready(out)
        ref = reference(x, params, actions, mp)
        assert out.shape == ref.shape, (out.shape, ref.shape)
        assert jnp.allclose(out, ref, atol=ATOL, rtol=RTOL), (
            mp, float(jnp.max(jnp.abs(out - ref))))

    # actions=None path (zeros, as in the PyTorch module)
    prep1 = prepare_params(params, (B, Cin, H, W), maxpool_size=1)
    out0 = jax.block_until_ready(
        augmented_model_forward(x, prep1,
                                action_history_size=action_history_size))
    ref0 = reference(x, params,
                     jnp.zeros((B, action_history_size), jnp.float32), 1)
    assert jnp.allclose(out0, ref0, atol=ATOL, rtol=RTOL)

    print("KERNEL_OK")
</pallas_src>

<mosaic_0001>
module attributes {stable_mosaic.version = 11 : i64} {
  func.func @fused_augmented_kernel(%arg0: i32, %arg1: memref<112x192xbf16, #tpu.memory_space<vmem>>, %arg2: memref<192x128xbf16, #tpu.memory_space<vmem>>, %arg3: memref<1x128xf32, #tpu.memory_space<vmem>>, %arg4: memref<32x1792xbf16, #tpu.memory_space<vmem>>, %arg5: memref<1x32xf32, #tpu.memory_space<vmem>>, %arg6: memref<32x32xf32, #tpu.memory_space<vmem>>, %arg7: memref<1x32xf32, #tpu.memory_space<vmem>>, %arg8: memref<2x16xf32, #tpu.memory_space<vmem>>, %arg9: memref<2x128xf32, #tpu.memory_space<vmem>>) attributes {dimension_semantics = [#tpu.dimension_semantics<arbitrary>], iteration_bounds = array<i64: 1>, scalar_prefetch = 0 : i64, scratch_operands = 0 : i64, tpu.core_type = #tpu.core_type<tc>, window_params = [{pipeline_mode = #tpu.pipeline_mode<synchronous>, transform_indices = @transform_0, window_bounds = array<i64: 112, 192>}, {pipeline_mode = #tpu.pipeline_mode<synchronous>, transform_indices = @transform_1, window_bounds = array<i64: 192, 128>}, {pipeline_mode = #tpu.pipeline_mode<synchronous>, transform_indices = @transform_2, window_bounds = array<i64: 1, 128>}, {pipeline_mode = #tpu.pipeline_mode<synchronous>, transform_indices = @transform_3, window_bounds = array<i64: 32, 1792>}, {pipeline_mode = #tpu.pipeline_mode<synchronous>, transform_indices = @transform_4, window_bounds = array<i64: 1, 32>}, {pipeline_mode = #tpu.pipeline_mode<synchronous>, transform_indices = @transform_5, window_bounds = array<i64: 32, 32>}, {pipeline_mode = #tpu.pipeline_mode<synchronous>, transform_indices = @transform_6, window_bounds = array<i64: 1, 32>}, {pipeline_mode = #tpu.pipeline_mode<synchronous>, transform_indices = @transform_7, window_bounds = array<i64: 2, 16>}, {pipeline_mode = #tpu.pipeline_mode<synchronous>, transform_indices = @transform_8, window_bounds = array<i64: 2, 128>}]} {
    %c0 = arith.constant 0 : index
    %c0_0 = arith.constant 0 : index
    %0 = vector.load %arg1[%c0, %c0_0] : memref<112x192xbf16, #tpu.memory_space<vmem>>, vector<112x192xbf16>
    %c0_1 = arith.constant 0 : index
    %c0_2 = arith.constant 0 : index
    %1 = vector.load %arg2[%c0_1, %c0_2] : memref<192x128xbf16, #tpu.memory_space<vmem>>, vector<192x128xbf16>
    %cst = arith.constant dense<0.000000e+00> : vector<112x128xf32>
    %2 = tpu.matmul %0, %1, %cst {dimension_numbers = #tpu.dot_dimension_numbers<[1], [0], [0], [1], [0, 0, 1, 1], [], []>} : vector<112x192xbf16>, vector<192x128xbf16>, vector<112x128xf32> -> vector<112x128xf32>
    %c0_3 = arith.constant 0 : index
    %c0_4 = arith.constant 0 : index
    %3 = vector.load %arg3[%c0_3, %c0_4] : memref<1x128xf32, #tpu.memory_space<vmem>>, vector<1x128xf32>
    %4 = vector.broadcast %3 : vector<1x128xf32> to vector<112x128xf32>
    %5 = arith.addf %2, %4 : vector<112x128xf32>
    %cst_5 = arith.constant 0.000000e+00 : f32
    %6 = vector.broadcast %cst_5 : f32 to vector<112x128xf32>
    %7 = arith.maximumf %5, %6 : vector<112x128xf32>
    %8 = vector.extract_strided_slice %7 {offsets = [0, 0], sizes = [2, 128], strides = [1, 1]} : vector<112x128xf32> to vector<2x128xf32>
    %9 = vector.extract_strided_slice %7 {offsets = [8, 0], sizes = [2, 128], strides = [1, 1]} : vector<112x128xf32> to vector<2x128xf32>
    %10 = vector.extract_strided_slice %7 {offsets = [16, 0], sizes = [2, 128], strides = [1, 1]} : vector<112x128xf32> to vector<2x128xf32>
    %11 = vector.extract_strided_slice %7 {offsets = [24, 0], sizes = [2, 128], strides = [1, 1]} : vector<112x128xf32> to vector<2x128xf32>
    %12 = vector.extract_strided_slice %7 {offsets = [32, 0], sizes = [2, 128], strides = [1, 1]} : vector<112x128xf32> to vector<2x128xf32>
    %13 = vector.extract_strided_slice %7 {offsets = [40, 0], sizes = [2, 128], strides = [1, 1]} : vector<112x128xf32> to vector<2x128xf32>
    %14 = vector.extract_strided_slice %7 {offsets = [48, 0], sizes = [2, 128], strides = [1, 1]} : vector<112x128xf32> to vector<2x128xf32>
    %15 = vector.extract_strided_slice %7 {offsets = [56, 0], sizes = [2, 128], strides = [1, 1]} : vector<112x128xf32> to vector<2x128xf32>
    %16 = vector.extract_strided_slice %7 {offsets = [64, 0], sizes = [2, 128], strides = [1, 1]} : vector<112x128xf32> to vector<2x128xf32>
    %17 = vector.extract_strided_slice %7 {offsets = [72, 0], sizes = [2, 128], strides = [1, 1]} : vector<112x128xf32> to vector<2x128xf32>
    %18 = vector.extract_strided_slice %7 {offsets = [80, 0], sizes = [2, 128], strides = [1, 1]} : vector<112x128xf32> to vector<2x128xf32>
    %19 = vector.extract_strided_slice %7 {offsets = [88, 0], sizes = [2, 128], strides = [1, 1]} : vector<112x128xf32> to vector<2x128xf32>
    %20 = vector.extract_strided_slice %7 {offsets = [96, 0], sizes = [2, 128], strides = [1, 1]} : vector<112x128xf32> to vector<2x128xf32>
    %21 = vector.extract_strided_slice %7 {offsets = [104, 0], sizes = [2, 128], strides = [1, 1]} : vector<112x128xf32> to vector<2x128xf32>
    %22 = tpu.concatenate %8, %9, %10, %11, %12, %13, %14, %15, %16, %17, %18, %19, %20, %21 in 1 : vector<2x128xf32>, vector<2x128xf32>, vector<2x128xf32>, vector<2x128xf32>, vector<2x128xf32>, vector<2x128xf32>, vector<2x128xf32>, vector<2x128xf32>, vector<2x128xf32>, vector<2x128xf32>, vector<2x128xf32>, vector<2x128xf32>, vector<2x128xf32>, vector<2x128xf32> -> vector<2x1792xf32>
    %23 = arith.truncf %22 : vector<2x1792xf32> to vector<2x1792xbf16>
    %c0_6 = arith.constant 0 : index
    %c0_7 = arith.constant 0 : index
    %24 = vector.load %arg4[%c0_6, %c0_7] : memref<32x1792xbf16, #tpu.memory_space<vmem>>, vector<32x1792xbf16>
    %cst_8 = arith.constant dense<0.000000e+00> : vector<2x32xf32>
    %25 = tpu.matmul %23, %24, %cst_8 {dimension_numbers = #tpu.dot_dimension_numbers<[1], [1], [0], [0], [0, 0, 1, 0], [], []>} : vector<2x1792xbf16>, vector<32x1792xbf16>, vector<2x32xf32> -> vector<2x32xf32>
    %c0_9 = arith.constant 0 : index
    %c0_10 = arith.constant 0 : index
    %26 = vector.load %arg5[%c0_9, %c0_10] : memref<1x32xf32, #tpu.memory_space<vmem>>, vector<1x32xf32>
    %27 = vector.broadcast %26 : vector<1x32xf32> to vector<2x32xf32>
    %28 = arith.addf %25, %27 : vector<2x32xf32>
    %cst_11 = arith.constant 0.000000e+00 : f32
    %29 = vector.broadcast %cst_11 : f32 to vector<2x32xf32>
    %30 = arith.maximumf %28, %29 : vector<2x32xf32>
    %c0_12 = arith.constant 0 : index
    %c0_13 = arith.constant 0 : index
    %31 = vector.load %arg6[%c0_12, %c0_13] : memref<32x32xf32, #tpu.memory_space<vmem>>, vector<32x32xf32>
    %cst_14 = arith.constant dense<0.000000e+00> : vector<2x32xf32>
    %32 = tpu.matmul %30, %31, %cst_14 {dimension_numbers = #tpu.dot_dimension_numbers<[1], [0], [0], [1], [0, 0, 1, 1], [], []>} : vector<2x32xf32>, vector<32x32xf32>, vector<2x32xf32> -> vector<2x32xf32>
    %c0_15 = arith.constant 0 : index
    %c0_16 = arith.constant 0 : index
    %33 = vector.load %arg7[%c0_15, %c0_16] : memref<1x32xf32, #tpu.memory_space<vmem>>, vector<1x32xf32>
    %34 = vector.broadcast %33 : vector<1x32xf32> to vector<2x32xf32>
    %35 = arith.addf %32, %34 : vector<2x32xf32>
    %cst_17 = arith.constant 0.000000e+00 : f32
    %36 = vector.broadcast %cst_17 : f32 to vector<2x32xf32>
    %37 = arith.maximumf %35, %36 : vector<2x32xf32>
    %38 = tpu.iota {dimensions = array<i32: 0>} : vector<32x128xi32>
    %39 = tpu.iota {dimensions = array<i32: 1>} : vector<32x128xi32>
    %c0_i32 = arith.constant 0 : i32
    %40 = vector.broadcast %c0_i32 : i32 to vector<32x128xi32>
    %41 = arith.addi %38, %40 : vector<32x128xi32>
    %42 = arith.cmpi eq, %39, %41 : vector<32x128xi32>
    %43 = arith.extui %42 : vector<32x128xi1> to vector<32x128xi32>
    %44 = arith.sitofp %43 : vector<32x128xi32> to vector<32x128xf32>
    %cst_18 = arith.constant dense<0.000000e+00> : vector<2x128xf32>
    %45 = tpu.matmul %37, %44, %cst_18 {dimension_numbers = #tpu.dot_dimension_numbers<[1], [0], [0], [1], [0, 0, 1, 1], [], []>} : vector<2x32xf32>, vector<32x128xf32>, vector<2x128xf32> -> vector<2x128xf32>
    %c0_19 = arith.constant 0 : index
    %c0_20 = arith.constant 0 : index
    %46 = vector.load %arg8[%c0_19, %c0_20] : memref<2x16xf32, #tpu.memory_space<vmem>>, vector<2x16xf32>
    %47 = tpu.iota {dimensions = array<i32: 0>} : vector<16x128xi32>
    %48 = tpu.iota {dimensions = array<i32: 1>} : vector<16x128xi32>
    %c32_i32 = arith.constant 32 : i32
    %49 = vector.broadcast %c32_i32 : i32 to vector<16x128xi32>
    %50 = arith.addi %47, %49 : vector<16x128xi32>
    %51 = arith.cmpi eq, %48, %50 : vector<16x128xi32>
    %52 = arith.extui %51 : vector<16x128xi1> to vector<16x128xi32>
    %53 = arith.sitofp %52 : vector<16x128xi32> to vector<16x128xf32>
    %cst_21 = arith.constant dense<0.000000e+00> : vector<2x128xf32>
    %54 = tpu.matmul %46, %53, %cst_21 {dimension_numbers = #tpu.dot_dimension_numbers<[1], [0], [0], [1], [0, 0, 1, 1], [], []>} : vector<2x16xf32>, vector<16x128xf32>, vector<2x128xf32> -> vector<2x128xf32>
    %55 = arith.addf %45, %54 : vector<2x128xf32>
    %c0_22 = arith.constant 0 : index
    %c0_23 = arith.constant 0 : index
    %56 = vector.load %arg9[%c0_22, %c0_23] : memref<2x128xf32, #tpu.memory_space<vmem>>, vector<2x128xf32>
    tpu.vector_store %arg9[%c0_22, %c0_23], %55 {strides = array<i32>} : memref<2x128xf32, #tpu.memory_space<vmem>>, vector<2x128xf32>,
    return
  }
  func.func @transform_0(%arg0: i32) -> (i32, i32) {
    %c0_i32 = arith.constant 0 : i32
    %c0_i32_0 = arith.constant 0 : i32
    %c0_i32_1 = arith.constant 0 : i32
    return %c0_i32, %c0_i32_0 : i32, i32
  }
  func.func @transform_1(%arg0: i32) -> (i32, i32) {
    %c0_i32 = arith.constant 0 : i32
    %c0_i32_0 = arith.constant 0 : i32
    %c0_i32_1 = arith.constant 0 : i32
    return %c0_i32, %c0_i32_0 : i32, i32
  }
  func.func @transform_2(%arg0: i32) -> (i32, i32) {
    %c0_i32 = arith.constant 0 : i32
    %c0_i32_0 = arith.constant 0 : i32
    %c0_i32_1 = arith.constant 0 : i32
    return %c0_i32, %c0_i32_0 : i32, i32
  }
  func.func @transform_3(%arg0: i32) -> (i32, i32) {
    %c0_i32 = arith.constant 0 : i32
    %c0_i32_0 = arith.constant 0 : i32
    %c0_i32_1 = arith.constant 0 : i32
    return %c0_i32, %c0_i32_0 : i32, i32
  }
  func.func @transform_4(%arg0: i32) -> (i32, i32) {
    %c0_i32 = arith.constant 0 : i32
    %c0_i32_0 = arith.constant 0 : i32
    %c0_i32_1 = arith.constant 0 : i32
    return %c0_i32, %c0_i32_0 : i32, i32
  }
  func.func @transform_5(%arg0: i32) -> (i32, i32) {
    %c0_i32 = arith.constant 0 : i32
    %c0_i32_0 = arith.constant 0 : i32
    %c0_i32_1 = arith.constant 0 : i32
    return %c0_i32, %c0_i32_0 : i32, i32
  }
  func.func @transform_6(%arg0: i32) -> (i32, i32) {
    %c0_i32 = arith.constant 0 : i32
    %c0_i32_0 = arith.constant 0 : i32
    %c0_i32_1 = arith.constant 0 : i32
    return %c0_i32, %c0_i32_0 : i32, i32
  }
  func.func @transform_7(%arg0: i32) -> (i32, i32) {
    %c0_i32 = arith.constant 0 : i32
    %c0_i32_0 = arith.constant 0 : i32
    %c0_i32_1 = arith.constant 0 : i32
    return %c0_i32, %c0_i32_0 : i32, i32
  }
  func.func @transform_8(%arg0: i32) -> (i32, i32) {
    %c0_i32 = arith.constant 0 : i32
    %c0_i32_0 = arith.constant 0 : i32
    %c0_i32_1 = arith.constant 0 : i32
    return %c0_i32, %c0_i32_0 : i32, i32
  }
}

</mosaic_0001>

<bundles_post_ra>
// kernel: tpu_custom_call.1
= control target key start
LH: loop header
LB: loop body
LE: loop exit
PB: predicated region body
PF: predicated region fallthrough
CT: control target
= control target key end

     0   :  { %13 = vsyncpa [#allocation3], 0  ;;  %s1605_s0 = inlined_call_operand.vmem [shape: bf16[112,192], index: 0, kind: input, shape index: {}]   ;;  %s1606_s1 = inlined_call_operand.vmem [shape: bf16[192,128], index: 1, kind: input, shape index: {}]   ;;  %s1607_s2 = inlined_call_operand.vmem [shape: f32[1,128], index: 2, kind: input, shape index: {}]   ;;  %s1608_s3 = inlined_call_operand.hbm [shape: bf16[32,1792], index: 3, kind: input, shape index: {}]   ;;  %s1609_s4 = inlined_call_operand.vmem [shape: f32[1,32], index: 4, kind: input, shape index: {}]   ;;  %s1610_s5 = inlined_call_operand.vmem [shape: f32[32,32], index: 5, kind: input, shape index: {}]   ;;  %s1611_s6 = inlined_call_operand.vmem [shape: f32[1,32], index: 6, kind: input, shape index: {}]   ;;  %s1612_s7 = inlined_call_operand.vmem [shape: f32[2,16], index: 7, kind: input, shape index: {}]   ;;  %s1613_s8 = inlined_call_operand.hbm [shape: f32[2,128], index: 8, kind: output, shape index: {}]  }
   0x1   :  { %14 = vsyncpa [#allocation4], 0  ;;  %s1392_s27 = smov [#allocation2]   ;;  %s1344_s9 = scalar_lea.hbm %s1608_s3, 3584 }
   0x2   :  { %s26_s28 = sshll.u32 %s1392_s27, 4  ;;  %p1345_p0 = scmp.ne.s32.totalorder %s1608_s3, %s1344_s9  ;;  %s27_s28 = int_to_ptr.vmem [resolvable:$true] %s26_s28 }
   0x3   :  { %p1348_p1 = scmp.lt.u32.totalorder %s1344_s9, %s1608_s3 }
   0x5   :  { %p1350_p2 = pnand %p1348_p1, %p1345_p0 }
   0x7   :  { %1353 = shalt.err (!%p1350_p2)
}
   0x8   :  { %s1354_s14 = scalar_lea.vmem %s27_s28, 3584  ;;  %p1359_p4 = scmp.lt.s32.totalorder %s27_s28, %s27_s28 }
   0x9   :  { %p1355_p3 = scmp.ne.s32.totalorder %s27_s28, %s1354_s14  ;;  %p1360_p5 = scmp.lt.s32.totalorder %s1354_s14, %s1354_s14 }
   0xb   :  { %p1361_p6 = por %p1360_p5, %p1359_p4 }
   0xd   :  { %p1362_p7 = pnand %p1361_p6, %p1355_p3 }
   0xf   :  { %1365 = shalt.err (!%p1362_p7)
}
  0x10   :  { %s1393_s15 = smov 896   ;;  %s1394_s16 = smov 56  }
  0x11   :  { %32 = dma.hbm_to_vmem [thread:$0]  %s1608_s3, 3584, %s27_s28, [#allocation3], %s1393_s15, %s1393_s15, %s1394_s16  }
  0x12   :  { %1388 = dma.done.wait [#allocation3], 3584  }
  0x13   :  { %1389 = vsyncadd [#allocation3], 4294963712  ;;  %v1395_v0 = vmov 0   ;;  %v1269_v1 = vld [vmem:[%s1606_s1] sm:$0xff]   ;;  %v1270_v2 = vld [vmem:[%s1606_s1 + $0x8] sm:$0xff]   ;;  %vm225_vm0 = vcmask 523264  }
  0x14   :  { %247 = vmatprep.subr.bf16.mxu0 %v1395_v0  ;;  %v1271_v3 = vld [vmem:[%s1606_s1 + $0x10] sm:$0xff]   ;;  %v1272_v4 = vld [vmem:[%s1606_s1 + $0x18] sm:$0xff]   ;;  %v1283_v5 = vld [vmem:[%s1605_s0 + $0x4] ss:$8 sps:$4 sm:$0xff]   ;;  %v1396_v35 = vmov 0.0|0.0   ;;  %vm1397_vm1 = vmmov 0  }
  0x15   :  { %248 = vmatpush1.bf16.msra.mxu0 %v1269_v1  ;;  %v1273_v6 = vld [vmem:[%s1606_s1 + $0x20] sm:$0xff]   ;;  %1124 = vmatprep.mubr.msk.bf16.mxu0 %vm225_vm0, %v1283_v5  ;;  %v1274_v7 = vld [vmem:[%s1606_s1 + $0x28] sm:$0xff]   ;;  %v1275_v8 = vld [vmem:[%s1606_s1 + $0x30] sm:$0xff]   ;;  %vm831_vm4 = vcmask 261120   ;;  %vm934_vm8 = vcmask 130048  }
  0x16   :  { %249 = vmatprep.subr.bf16.mxu0 %v1395_v0  ;;  %v1302_v9 = vld [vmem:[#allocation2 + $0x4] ss:$56 sps:$4 sm:$0xff]   ;;  %v1304_v10 = vld [vmem:[#allocation2] ss:$56 sps:$4 sm:$0xff]   ;;  %v1278_v13 = vld [vmem:[%s1606_s1 + $0x48] sm:$0xff]  }
  0x17   :  { %v1276_v11 = vld [vmem:[%s1606_s1 + $0x38] sm:$0xff]   ;;  %539 = vmatprep.subr.bf16.mxu1 %v1302_v9  ;;  %v1277_v12 = vld [vmem:[%s1606_s1 + $0x40] sm:$0xff]   ;;  %v1279_v14 = vld [vmem:[%s1606_s1 + $0x50] sm:$0xff]  }
  0x18   :  { %540 = vmatpush1.bf16.xpose.msra.mxu1 %v1304_v10  ;;  %v1280_v15 = vld [vmem:[%s1606_s1 + $0x58] sm:$0xff]   ;;  %v1281_v16 = vld [vmem:[%s1605_s0] ss:$8 sps:$4 sm:$0xff]   ;;  %v1287_v19 = vld [vmem:[%s1605_s0 + $0x24] ss:$8 sps:$4 sm:$0xff]  }
  0x19   :  { %250 = vmatpush1.bf16.msra.mxu0 %v1270_v2  ;;  %v1284_v17 = vld [vmem:[%s1605_s0 + $0x14] ss:$8 sps:$4 sm:$0xff]   ;;  %v1286_v18 = vld [vmem:[%s1605_s0 + $0x10] ss:$8 sps:$4 sm:$0xff]   ;;  %v1289_v20 = vld [vmem:[%s1605_s0 + $0x20] ss:$8 sps:$4 sm:$0xff]  }
  0x1a   :  { %251 = vmatprep.subr.bf16.mxu0 %v1395_v0  ;;  %v1290_v21 = vld [vmem:[%s1605_s0 + $0x34] ss:$8 sps:$4 sm:$0xff]   ;;  %v1292_v22 = vld [vmem:[%s1605_s0 + $0x30] ss:$8 sps:$4 sm:$0xff]   ;;  %v1293_v23 = vld [vmem:[%s1605_s0 + $0x44] ss:$8 sps:$4 sm:$0xff]  }
  0x1b   :  { %v1295_v24 = vld [vmem:[%s1605_s0 + $0x40] ss:$8 sps:$4 sm:$0xff]   ;;  %v1296_v25 = vld [vmem:[%s1605_s0 + $0x54] ss:$8 sps:$4 sm:$0xff]   ;;  %v1298_v26 = vld [vmem:[%s1605_s0 + $0x50] ss:$8 sps:$4 sm:$0xff]  }
  0x1c   :  { %v1299_v27 = vld [vmem:[%s1605_s0 + $0x64] ss:$8 sps:$4 sm:$0xff]   ;;  %v1301_v28 = vld [vmem:[%s1605_s0 + $0x60] ss:$8 sps:$4 sm:$0xff]   ;;  %v822_v34 = vld [vmem:[%s1610_s5 + $0x10] sm:$0xff] }
  0x1d   :  { %252 = vmatpush1.bf16.msra.mxu0 %v1271_v3  ;;  %v1305_v29 = vld [vmem:[#allocation2 + $0x74] ss:$56 sps:$4 sm:$0xff]   ;;  %v1307_v30 = vld [vmem:[#allocation2 + $0x70] ss:$56 sps:$4 sm:$0xff]   ;;  %v820_v32 = vld [vmem:[%s1610_s5] sm:$0xff] }
  0x1e   :  { %253 = vmatprep.subr.bf16.mxu0 %v1395_v0  ;;  %541 = vmatprep.subr.bf16.mxu1 %v1305_v29  ;;  %v1310_v31 = vld [vmem:[#allocation2 + $0xc] ss:$56 sps:$4 sm:$0xff]   ;;  %v823_v37 = vld [vmem:[%s1610_s5 + $0x18] sm:$0xff]  ;;  %v1561_v39 = vld [vmem:[%s1607_s2] ss:$0 sm:$0xff] }
  0x1f   :  { %v821_v33 = vld [vmem:[%s1610_s5 + $0x8] sm:$0xff]  ;;  %v1222_v38 = vpack.c.bf16 %v823_v37, %v822_v34  ;;  %v1313_v52 = vld [vmem:[#allocation2 + $0x7c] ss:$56 sps:$4 sm:$0xff]   ;;  %v1311_v59 = vld [vmem:[#allocation2 + $0x78] ss:$56 sps:$4 sm:$0xff]  }
  0x20   :  { %542 = vmatpush1.bf16.xpose.msra.mxu1 %v1307_v30  ;;  %v1219_v36 = vpack.c.bf16 %v821_v33, %v820_v32  ;;  %v1308_v49 = vld [vmem:[#allocation2 + $0x8] ss:$56 sps:$4 sm:$0xff]   ;;  %v1316_v61 = vld [vmem:[#allocation2 + $0x14] ss:$56 sps:$4 sm:$0xff]  }
  0x21   :  { %254 = vmatpush1.bf16.msra.mxu0 %v1272_v4  ;;  %579 = vmatprep.subr.bf16.mxu1 %v1310_v31  ;;  %v1314_v5 = vld [vmem:[#allocation2 + $0x10] ss:$56 sps:$4 sm:$0xff]  }
  0x22   :  { %255 = vmatprep.subr.bf16.mxu0 %v1395_v0  ;;  %v1323_v34 = vld [vmem:[#allocation2 + $0x88] ss:$56 sps:$4 sm:$0xff]  }
  0x25   :  { %256 = vmatpush1.bf16.msra.mxu0 %v1273_v6 }
  0x26   :  { %257 = vmatprep.subr.bf16.mxu0 %v1395_v0 }
  0x29   :  { %258 = vmatpush1.bf16.msra.mxu0 %v1274_v7 }
  0x2a   :  { %259 = vmatprep.subr.bf16.mxu0 %v1395_v0 }
  0x2d   :  { %260 = vmatpush1.bf16.msra.mxu0 %v1275_v8  ;;  %v1319_v8 = vld [vmem:[#allocation2 + $0x84] ss:$56 sps:$4 sm:$0xff]  }
  0x2e   :  { %261 = vmatprep.subr.bf16.mxu0 %v1395_v0 }
  0x31   :  { %262 = vmatpush1.bf16.msra.mxu0 %v1276_v11 }
  0x32   :  { %263 = vmatprep.subr.bf16.mxu0 %v1395_v0 }
  0x35   :  { %264 = vmatpush1.bf16.msra.mxu0 %v1277_v12 }
  0x36   :  { %265 = vmatprep.subr.bf16.mxu0 %v1395_v0 }
  0x39   :  { %266 = vmatpush1.bf16.msra.mxu0 %v1278_v13  ;;  %v1317_v13 = vld [vmem:[#allocation2 + $0x80] ss:$56 sps:$4 sm:$0xff]  }
  0x3a   :  { %267 = vmatprep.subr.bf16.mxu0 %v1395_v0 }
  0x3d   :  { %268 = vmatpush1.bf16.msra.mxu0 %v1279_v14 }
  0x3e   :  { %269 = vmatprep.subr.bf16.mxu0 %v1395_v0 }
  0x41   :  { %270 = vmatpush1.bf16.msra.mxu0 %v1280_v15 }
  0x42   :  { %1218 = vmatprep.subr.bf16.mxu0 %v1396_v35 }
  0x44   :  { %280 = vmatmul.mubr.bf16.vlgmr.msra.gmra.mrb[0].mxu0 %v1281_v16  ;;  %v1322_v16 = vld [vmem:[#allocation2 + $0x1c] ss:$56 sps:$4 sm:$0xff]  }
  0x45   :  { %1125 = vmatprep.mubr.msk.bf16.mxu0 %vm225_vm0, %v1284_v17  ;;  %1220 = vmatpush3.bf16.msra.mxu0 %v1219_v36 }
  0x46   :  { %1221 = vmatprep.subr.bf16.mxu0 %v1396_v35 }
  0x49   :  { %1223 = vmatpush3.bf16.msra.mxu0 %v1222_v38  ;;  %v1328_v38 = vld [vmem:[#allocation2 + $0x24] ss:$56 sps:$4 sm:$0xff]  }
  0x4a   :  { %1224 = vmatprep.subr.bf16.mxu0 %v1396_v35 }
  0x4c   :  { %288 = vmatmul.mubr.bf16.gmra.mrb[4].mxu0 %v1286_v18 }
  0x4d   :  { %1126 = vmatprep.mubr.msk.bf16.mxu0 %vm225_vm0, %v1287_v19 }
  0x54   :  { %296 = vmatmul.mubr.bf16.gmra.mrb[8].mxu0 %v1289_v20 }
  0x55   :  { %1127 = vmatprep.mubr.msk.bf16.mxu0 %vm225_vm0, %v1290_v21 }
  0x5c   :  { %304 = vmatmul.mubr.bf16.gmra.mrb[12].mxu0 %v1292_v22 }
  0x5d   :  { %1128 = vmatprep.mubr.msk.bf16.mxu0 %vm225_vm0, %v1293_v23 }
  0x64   :  { %312 = vmatmul.mubr.bf16.gmra.mrb[16].mxu0 %v1295_v24  ;;  %v1320_v24 = vld [vmem:[#allocation2 + $0x18] ss:$56 sps:$4 sm:$0xff]  }
  0x65   :  { %1129 = vmatprep.mubr.msk.bf16.mxu0 %vm225_vm0, %v1296_v25 }
  0x6c   :  { %320 = vmatmul.mubr.bf16.gmra.mrb[20].mxu0 %v1298_v26 }
  0x6d   :  { %1130 = vmatprep.mubr.msk.bf16.mxu0 %vm225_vm0, %v1299_v27  ;;  %v1325_v27 = vld [vmem:[#allocation2 + $0x8c] ss:$56 sps:$4 sm:$0xff]  }
  0x74   :  { %328 = vmatmul.mubr.bf16.gmra.mrb[24].mxu0 %v1301_v28 }
 0x117   :  { %v281_v40 = vpop.f32.mrb[0].mxu0 }
 0x118   :  { %v282_v41 = vadd.f32 %v1561_v39, %v281_v40  ;;  %v283_v42 = vpop.f32.mrb[1].mxu0 }
 0x119   :  { %v284_v43 = vpop.f32.mrb[2].mxu0 }
 0x11a   :  { %v285_v44 = vadd.f32 %v1561_v39, %v284_v43  ;;  %v286_v45 = vpop.f32.mrb[3].mxu0  ;;  %v336_v46 = vmax.f32 %v282_v41, 0.0 }
 0x11c   :  { %v337_v47 = vmax.f32 %v285_v44, 0.0  ;;  %v350_v50 = vpack.c.bf16 %v336_v46, %v336_v46 }
 0x11e   :  { %v351_v48 = vpack.c.bf16 %v337_v47, %v337_v47 }
 0x11f   :  { %v289_v51 = vpop.f32.mrb[4].mxu0 }
 0x120   :  { %571 = vmatprep.mubr.bf16.mxu1 %v351_v48  ;;  %v291_v53 = vpop.f32.mrb[5].mxu0  ;;  %v290_v60 = vadd.f32 %v1561_v39, %v289_v51  ;;  %v1326_v48 = vld [vmem:[#allocation2 + $0x20] ss:$56 sps:$4 sm:$0xff]   ;;  %v1331_v51 = vld [vmem:[#allocation2 + $0x94] ss:$56 sps:$4 sm:$0xff]  }
 0x121   :  { %572 = vmatmul.mubr.bf16.vlgmr.msra.gmra.mrb[0].mxu1 %v350_v50  ;;  %v292_v54 = vpop.f32.mrb[6].mxu0  ;;  %v1334_v53 = vld [vmem:[#allocation2 + $0x2c] ss:$56 sps:$4 sm:$0xff]  }
 0x122   :  { %580 = vmatpush1.bf16.xpose.msra.mxu1 %v1308_v49  ;;  %v293_v55 = vadd.f32 %v1561_v39, %v292_v54  ;;  %v294_v56 = vpop.f32.mrb[7].mxu0  ;;  %v338_v3 = vmax.f32 %v290_v60, 0.0  ;;  %v1340_v60 = vld [vmem:[#allocation2 + $0x34] ss:$56 sps:$4 sm:$0xff]  }
 0x123   :  { %581 = vmatprep.subr.bf16.mxu1 %v1313_v52  ;;  %v1329_v52 = vld [vmem:[#allocation2 + $0x90] ss:$56 sps:$4 sm:$0xff]  }
 0x124   :  { %v339_v57 = vmax.f32 %v293_v55, 0.0  ;;  %v352_v7 = vpack.c.bf16 %v338_v3, %v338_v3  ;;  %v1332_v56 = vld [vmem:[#allocation2 + $0x28] ss:$56 sps:$4 sm:$0xff]  }
 0x125   :  { %v1341_v3 = vld [vmem:[#allocation2 + $0xa0] ss:$56 sps:$4 sm:$0xff]  }
 0x126   :  { %v353_v58 = vpack.c.bf16 %v339_v57, %v339_v57 }
 0x127   :  { %v297_v62 = vpop.f32.mrb[8].mxu0 }
 0x128   :  { %611 = vmatprep.mubr.bf16.mxu1 %v353_v58  ;;  %v299_v63 = vpop.f32.mrb[9].mxu0  ;;  %v298_v15 = vadd.f32 %v1561_v39, %v297_v62  ;;  %v1337_v58 = vld [vmem:[#allocation2 + $0x9c] ss:$56 sps:$4 sm:$0xff]  }
 0x129   :  { %v300_v0 = vpop.f32.mrb[10].mxu0  ;;  %v1338_v63 = vld [vmem:[#allocation2 + $0x30] ss:$56 sps:$4 sm:$0xff]  }
 0x12a   :  { %582 = vmatpush1.bf16.xpose.msra.mxu1 %v1311_v59  ;;  %v301_v1 = vadd.f32 %v1561_v39, %v300_v0  ;;  %v302_v2 = vpop.f32.mrb[11].mxu0  ;;  %v340_v23 = vmax.f32 %v298_v15, 0.0  ;;  %v1335_v59 = vld [vmem:[#allocation2 + $0x98] ss:$56 sps:$4 sm:$0xff]  }
 0x12b   :  { %619 = vmatprep.subr.bf16.mxu1 %v1316_v61  ;;  %v1343_v2 = vld [vmem:[#allocation2 + $0xa4] ss:$56 sps:$4 sm:$0xff]  }
 0x12c   :  { %v341_v4 = vmax.f32 %v301_v1, 0.0  ;;  %v354_v26 = vpack.c.bf16 %v340_v23, %v340_v23 }
 0x12e   :  { %v355_v6 = vpack.c.bf16 %v341_v4, %v341_v4 }
 0x12f   :  { %v305_v9 = vpop.f32.mrb[12].mxu0 }
 0x130   :  { %v307_v10 = vpop.f32.mrb[13].mxu0  ;;  %v306_v37 = vadd.f32 %v1561_v39, %v305_v9 }
 0x131   :  { %612 = vmatmul.mubr.bf16.vlgmr.msra.gmra.mrb[0].mxu1 %v352_v7  ;;  %v308_v11 = vpop.f32.mrb[14].mxu0  ;;  %v906_v7 = vlaneseq }
 0x132   :  { %620 = vmatpush1.bf16.xpose.msra.mxu1 %v1314_v5  ;;  %651 = vmatprep.mubr.bf16.mxu1 %v355_v6  ;;  %v310_v12 = vpop.f32.mrb[15].mxu0  ;;  %v309_v14 = vadd.f32 %v1561_v39, %v308_v11  ;;  %v342_v47 = vmax.f32 %v306_v37, 0.0  ;;  %v1398_v6 = vmov 0.0  }
 0x133   :  { %621 = vmatprep.subr.bf16.mxu1 %v1319_v8  ;;  %1197 = vmatprep.mubr.msk.f32.mxu0 %vm1397_vm1, %v1398_v6  ;;  %v907_v8 = vshrl.u32 %v906_v7, 7  ;;  %v912_v10 = vand.u32 127, %v906_v7 }
 0x134   :  { %v343_v21 = vmax.f32 %v309_v14, 0.0  ;;  %v356_v50 = vpack.c.bf16 %v342_v47, %v342_v47 }
 0x135   :  { %v908_v9 = vadd.s32 8, %v907_v8  ;;  %v926_v11 = vadd.s32 32, %v907_v8  ;;  %vm913_vm6 = vcmp.eq.s32.totalorder %v912_v10, %v907_v8  ;;  %v910_v23 = vadd.s32 24, %v907_v8 }
 0x136   :  { %v357_v25 = vpack.c.bf16 %v343_v21, %v343_v21  ;;  %v925_v21 = vld [vmem:[%s1612_s7] sm:$0x3]  ;;  %s1400_s7 = smov [#allocation5]  }
 0x137   :  { %v313_v17 = vpop.f32.mrb[16].mxu0  ;;  %v927_v12 = vadd.s32 32, %v908_v9  ;;  %vm928_vm2 = vcmp.eq.s32.totalorder %v912_v10, %v926_v11  ;;  %vm914_vm7 = vcmp.eq.s32.totalorder %v912_v10, %v908_v9  ;;  %vm916_vm11 = vcmp.eq.s32.totalorder %v912_v10, %v910_v23  ;;  %s1088_s12 = sshll.u32 %s1400_s7, 4  ;;  %s1089_s12 = int_to_ptr.vmem [resolvable:$true] %s1088_s12 }
 0x138   :  { %v314_v18 = vadd.f32 %v1561_v39, %v313_v17  ;;  %v315_v19 = vpop.f32.mrb[17].mxu0  ;;  %vm1228_vm9 = vmpackc.low %vm914_vm7, %vm913_vm6  ;;  %s1366_s13 = scalar_lea.vmem %s1089_s12, 32  ;;  %p1371_p9 = scmp.lt.s32.totalorder %s1089_s12, %s1089_s12 }
 0x139   :  { %v316_v20 = vpop.f32.mrb[18].mxu0  ;;  %vm929_vm3 = vcmp.eq.s32.totalorder %v912_v10, %v927_v12  ;;  %p1367_p8 = scmp.ne.s32.totalorder %s1089_s12, %s1366_s13  ;;  %p1372_p10 = scmp.lt.s32.totalorder %s1366_s13, %s1366_s13 }
 0x13a   :  { %622 = vmatpush1.bf16.xpose.msra.mxu1 %v1317_v13  ;;  %v318_v22 = vpop.f32.mrb[19].mxu0  ;;  %v317_v36 = vadd.f32 %v1561_v39, %v316_v20  ;;  %v344_v55 = vmax.f32 %v314_v18, 0.0  ;;  %v1131_v13 = vld [vmem:[%s1609_s4] ss:$0 sm:$0xff]  ;;  %vm1225_vm5 = vmpackc.low %vm929_vm3, %vm928_vm2  ;;  %v1399_v20 = vmov 1.0|1.0  }
 0x13b   :  { %659 = vmatprep.subr.bf16.mxu1 %v1322_v16  ;;  %v909_v22 = vadd.s32 16, %v907_v8  ;;  %p1373_p11 = por %p1372_p10, %p1371_p9 }
 0x13c   :  { %v345_v44 = vmax.f32 %v317_v36, 0.0 }
 0x13d   :  { %vm915_vm10 = vcmp.eq.s32.totalorder %v912_v10, %v909_v22  ;;  %p1374_p12 = pnand %p1373_p11, %p1367_p8 }
 0x13e   :  { %v359_v49 = vpack.c.bf16 %v345_v44, %v345_v44  ;;  %vm1231_vm12 = vmpackc.low %vm916_vm11, %vm915_vm10 }
 0x13f   :  { %v321_v28 = vpop.f32.mrb[20].mxu0 }
 0x140   :  { %v322_v29 = vadd.f32 %v1561_v39, %v321_v28  ;;  %v323_v30 = vpop.f32.mrb[21].mxu0 }
 0x141   :  { %652 = vmatmul.mubr.bf16.vlgmr.msra.gmra.mrb[0].mxu1 %v354_v26  ;;  %v324_v31 = vpop.f32.mrb[22].mxu0 }
 0x142   :  { %660 = vmatpush1.bf16.xpose.msra.mxu1 %v1320_v24  ;;  %691 = vmatprep.mubr.bf16.mxu1 %v357_v25  ;;  %v325_v32 = vadd.f32 %v1561_v39, %v324_v31  ;;  %v326_v33 = vpop.f32.mrb[23].mxu0  ;;  %v346_v62 = vmax.f32 %v322_v29, 0.0  ;;  %v1160_v24 = vld [vmem:[%s1611_s6] ss:$0 sm:$0xff] }
 0x143   :  { %661 = vmatprep.subr.bf16.mxu1 %v1325_v27 }
 0x144   :  { %v347_v54 = vmax.f32 %v325_v32, 0.0  ;;  %v360_v1 = vpack.c.bf16 %v346_v62, %v346_v62 }
 0x146   :  { %v361_v57 = vpack.c.bf16 %v347_v54, %v347_v54 }
 0x147   :  { %v329_v40 = vpop.f32.mrb[24].mxu0 }
 0x148   :  { %v330_v41 = vadd.f32 %v1561_v39, %v329_v40  ;;  %v331_v42 = vpop.f32.mrb[25].mxu0 }
 0x149   :  { %v332_v43 = vpop.f32.mrb[26].mxu0 }
 0x14a   :  { %662 = vmatpush1.bf16.xpose.msra.mxu1 %v1323_v34  ;;  %v333_v45 = vadd.f32 %v1561_v39, %v332_v43  ;;  %v334_v46 = vpop.f32.mrb[27].mxu0  ;;  %v358_v39 = vpack.c.bf16 %v344_v55, %v344_v55  ;;  %v348_v4 = vmax.f32 %v330_v41, 0.0 }
 0x14b   :  { %699 = vmatprep.subr.bf16.mxu1 %v1328_v38 }
 0x14c   :  { %v349_v61 = vmax.f32 %v333_v45, 0.0  ;;  %v362_v5 = vpack.c.bf16 %v348_v4, %v348_v4 }
 0x14e   :  { %v363_v0 = vpack.c.bf16 %v349_v61, %v349_v61 }
 0x151   :  { %692 = vmatmul.mubr.bf16.vlgmr.msra.gmra.mrb[0].mxu1 %v356_v50 }
 0x152   :  { %700 = vmatpush1.bf16.xpose.msra.mxu1 %v1326_v48  ;;  %731 = vmatprep.mubr.bf16.mxu1 %v359_v49 }
 0x153   :  { %701 = vmatprep.subr.bf16.mxu1 %v1331_v51 }
 0x15a   :  { %702 = vmatpush1.bf16.xpose.msra.mxu1 %v1329_v52 }
 0x15b   :  { %739 = vmatprep.subr.bf16.mxu1 %v1334_v53 }
 0x161   :  { %732 = vmatmul.mubr.bf16.vlgmr.msra.gmra.mrb[0].mxu1 %v358_v39 }
 0x162   :  { %740 = vmatpush1.bf16.xpose.msra.mxu1 %v1332_v56  ;;  %771 = vmatprep.mubr.bf16.mxu1 %v361_v57 }
 0x163   :  { %741 = vmatprep.subr.bf16.mxu1 %v1337_v58 }
 0x16a   :  { %742 = vmatpush1.bf16.xpose.msra.mxu1 %v1335_v59 }
 0x16b   :  { %779 = vmatprep.subr.bf16.mxu1 %v1340_v60 }
 0x171   :  { %772 = vmatmul.mubr.bf16.vlgmr.msra.gmra.mrb[0].mxu1 %v360_v1 }
 0x172   :  { %780 = vmatpush1.bf16.xpose.msra.mxu1 %v1338_v63  ;;  %811 = vmatprep.mubr.bf16.mxu1 %v363_v0 }
 0x173   :  { %781 = vmatprep.subr.bf16.mxu1 %v1343_v2 }
 0x17a   :  { %782 = vmatpush1.bf16.xpose.msra.mxu1 %v1341_v3 }
 0x181   :  { %812 = vmatmul.mubr.bf16.vlgmr.msra.gmra.mrb[0].mxu1 %v362_v5 }
 0x254   :  { %v813_v14 = vpop.f32.mrb[0].mxu1 }
 0x255   :  { %v1233_v15 = vadd.f32 %v1131_v13, %v813_v14  ;;  %v815_v16 = vpop.f32.mrb[1].mxu1 }
 0x256   :  { %v816_v17 = vpop.f32.mrb[2].mxu1 }
 0x257   :  { %v819_v18 = vmax.f32 %v1233_v15, 0.0  ;;  %v817_v19 = vpop.f32.mrb[3].mxu1 }
 0x259   :  { %1198 = vmatmul.mubr.msk.f32.vlgmr.msra.gmra.mrb[28].mxu0 %vm831_vm4, %v819_v18 }
 0x25a   :  { %1226 = vmatpush3.bf16.msk.msra.mxu0 %vm1225_vm5, %v1399_v20  ;;  %1204 = vmatprep.mubr.msk.f32.mxu0 %vm1397_vm1, %v1398_v6 }
 0x25b   :  { %1227 = vmatprep.subr.bf16.mxu0 %v1396_v35 }
 0x25d   :  { %1205 = vmatmul.mubr.msk.f32.vlgmr.msra.gmra.mrb[30].mxu0 %vm934_vm8, %v925_v21 }
 0x25e   :  { %1229 = vmatpush3.bf16.msk.msra.mxu0 %vm1228_vm9, %v1399_v20  ;;  %1215 = vmatprep.mubr.msk.f32.mxu0 %vm1397_vm1, %v1398_v6 }
 0x25f   :  { %1230 = vmatprep.subr.bf16.mxu0 %v1396_v35 }
 0x262   :  { %1232 = vmatpush3.bf16.msk.msra.mxu0 %vm1231_vm12, %v1399_v20 }
 0x32c   :  { %v901_v25 = vpop.f32.mrb[28].mxu0 }
 0x32d   :  { %v902_v26 = vadd.f32 %v1160_v24, %v901_v25  ;;  %v1199_v27 = vpop.f32.mrb[29].mxu0 }
 0x32f   :  { %v905_v28 = vmax.f32 %v902_v26, 0.0 }
 0x331   :  { %1216 = vmatmul.mubr.msk.f32.vlgmr.msra.gmra.mrb[30].mxu0 %vm831_vm4, %v905_v28 }
 0x404   :  { %v1077_v35 = vpop.f32.mrb[30].mxu0 }
 0x405   :  { %1081 = vst [vmem:[#allocation5] sm:$0x3] %v1077_v35  ;;  %v1217_v29 = vpop.f32.mrb[31].mxu0 }
 0x406   :  { %1377 = shalt.err (!%p1374_p12)
}
 0x407   :  { %s1378_s15 = scalar_lea.hbm %s1613_s8, 32 }
 0x408   :  { %p1379_p13 = scmp.ne.s32.totalorder %s1613_s8, %s1378_s15  ;;  %p1382_p0 = scmp.lt.u32.totalorder %s1378_s15, %s1613_s8 }
 0x40a   :  { %p1384_p1 = pnand %p1382_p0, %p1379_p13 }
 0x40c   :  { %1387 = shalt.err (!%p1384_p1)
}
 0x40d   :  { %1091 = dma.vmem_to_hbm [thread:$0]  %s1089_s12, 32, %s1613_s8, [#allocation4]  }
 0x40e   :  { %1390 = dma.done.wait [#allocation4], 32  }
 0x40f   :  { %1391 = vsyncadd [#allocation4], 4294967264 }
 0x410   :  { %1095 = vsyncpa [#allocation3], 1 }
 0x411   :  { %1096 = vsyncpa [#allocation4], 1 }

</bundles_post_ra>
